<compile_context>
chip_gen: v7x
topology: tpu7x:2x2x1
jax: 0.10.0
libtpu: 0.0.40
codegen_flags: <defaults>
</compile_context>

<pallas_src>
import jax
import jax.numpy as jnp
from jax.experimental import pallas as pl
from jax.experimental.pallas import tpu as pltpu

HIDDEN1 = 256
HIDDEN2 = 512
HIDDEN = 256
HEAD_PAD = 128      # fused (mean | log_std | value) head lanes, padded to one lane tile
TM_CAP = 512        # max batch rows per grid step


def _round_up(n, m):
    return ((n + m - 1) // m) * m


def _cdiv(a, b):
    return -(-a // b)


def _ppo_kernel(x_ref,
                w1_ref, b1_ref,
                w2_ref, b2_ref,
                wh_ref, bh_ref,
                out_ref):
    # encoding_layer: Linear -> ReLU -> Linear -> ReLU, then the (folded)
    # Linear(512,256) -> {actor, critic} head as a single (512,128) matmul.
    x = x_ref[...].astype(jnp.bfloat16)                              # (TM, F)
    h1 = jnp.dot(x, w1_ref[...], preferred_element_type=jnp.float32) + b1_ref[...]
    h1 = jnp.maximum(h1, 0.0).astype(jnp.bfloat16)                   # (TM, 256)
    h2 = jnp.dot(h1, w2_ref[...], preferred_element_type=jnp.float32) + b2_ref[...]
    h2 = jnp.maximum(h2, 0.0).astype(jnp.bfloat16)                   # (TM, 512)
    # lane-dense f32 output slab: [mean | log_std | value | zeros]
    out_ref[...] = (jnp.dot(h2, wh_ref[...], preferred_element_type=jnp.float32)
                    + bh_ref[...])


def pack_params(p, obs_features, num_actions):
    """Fuse / fold / cast the logical f32 params into the kernel layout."""
    a2 = 2 * num_actions
    assert a2 + 1 <= HEAD_PAD

    # Fused actor|critic head, lane-padded to 128 (f32).
    wh = jnp.zeros((HIDDEN, HEAD_PAD), jnp.float32)
    wh = wh.at[:, :a2].set(p["wp"])
    wh = wh.at[:, a2:a2 + 1].set(p["wv"])
    bh = jnp.zeros((1, HEAD_PAD), jnp.float32)
    bh = bh.at[:, :a2].set(p["bp"])
    bh = bh.at[:, a2:a2 + 1].set(p["bv"])

    # Fold encoding layer 3 (512->256, no activation after it) into the head:
    # one (512,128) matmul replaces the (512,256) + (256,128) pair.
    w_head = jnp.dot(p["w3"], wh)                 # f32 fold, exact
    b_head = jnp.dot(p["b3"], wh) + bh

    return dict(
        w1=p["w1"].astype(jnp.bfloat16), b1=p["b1"].astype(jnp.float32),
        w2=p["w2"].astype(jnp.bfloat16), b2=p["b2"].astype(jnp.float32),
        wh=w_head.astype(jnp.bfloat16),  bh=b_head.astype(jnp.float32),
    )


def _choose_tiling(batch):
    """Pick (TM, B_pad, num_tiles): near-divisor tiles, TM <= TM_CAP, and an
    even tile count (>=2) once the batch is big enough so the 'parallel'
    batch axis can feed both v7x TensorCores."""
    b8 = _round_up(max(batch, 1), 8)
    if b8 < 16:
        num_tiles = 1
    else:
        num_tiles = max(2 * _cdiv(b8, 2 * TM_CAP), 2)
    tm = _round_up(_cdiv(b8, num_tiles), 8)
    return tm, num_tiles * tm, num_tiles


def bipedal_walker_ppo_forward(x, packed, num_actions):
    """x: (B, obs_features) f32. Returns (mean (B,A), std (B,A), value (B,1))."""
    B, F = x.shape
    TM, B_pad, num_tiles = _choose_tiling(B)
    if B_pad != B:
        x = jnp.pad(x, ((0, B_pad - B), (0, 0)))

    def w_spec(shape):
        # Constant block index: weights stay VMEM-resident (DMA'd once).
        return pl.BlockSpec(shape, lambda i: (0, 0))

    out = pl.pallas_call(
        _ppo_kernel,
        out_shape=jax.ShapeDtypeStruct((B_pad, HEAD_PAD), jnp.float32),
        grid_spec=pltpu.PrefetchScalarGridSpec(
            num_scalar_prefetch=0,
            grid=(num_tiles,),
            in_specs=[
                pl.BlockSpec((TM, F), lambda i: (i, 0)),          # x tile (f32)
                w_spec((F, HIDDEN1)),        w_spec((1, HIDDEN1)),
                w_spec((HIDDEN1, HIDDEN2)),  w_spec((1, HIDDEN2)),
                w_spec((HIDDEN2, HEAD_PAD)), w_spec((1, HEAD_PAD)),
            ],
            out_specs=pl.BlockSpec((TM, HEAD_PAD), lambda i: (i, 0)),
        ),
        compiler_params=pltpu.CompilerParams(
            dimension_semantics=("parallel",),      # shard batch tiles over TCs
            vmem_limit_bytes=32 * 1024 * 1024,      # headroom for TM=512 on v5e
        ),
    )(x,
      packed["w1"], packed["b1"],
      packed["w2"], packed["b2"],
      packed["wh"], packed["bh"])

    # Unpack the lane-dense slab in the wrapper (cheap XLA slices; keeps all
    # kernel stores unmasked and lane-dense).
    mean = out[:B, :num_actions]
    std = jnp.exp(out[:B, num_actions:2 * num_actions])
    value = out[:B, 2 * num_actions:2 * num_actions + 1]
    return mean, std, value


def init_params(key, obs_features, num_actions, hidden=HIDDEN):
    """Deterministic synthetic parameter init (PyTorch-equivalent shapes, f32)."""
    ks = jax.random.split(key, 5)

    def linear(k, fan_in, fan_out):
        kw, kb = jax.random.split(k)
        bound = 1.0 / jnp.sqrt(fan_in)
        w = jax.random.uniform(kw, (fan_in, fan_out), jnp.float32, -bound, bound)
        b = jax.random.uniform(kb, (1, fan_out), jnp.float32, -bound, bound)
        return w, b

    w1, b1 = linear(ks[0], obs_features, HIDDEN1)
    w2, b2 = linear(ks[1], HIDDEN1, HIDDEN2)
    w3, b3 = linear(ks[2], HIDDEN2, hidden)
    wp, bp = linear(ks[3], hidden, 2 * num_actions)   # GaussianPolicy head
    wv, bv = linear(ks[4], hidden, 1)                 # critic

    return dict(w1=w1, b1=b1, w2=w2, b2=b2, w3=w3, b3=b3,
                wp=wp, bp=bp, wv=wv, bv=bv)


def reference_forward_packed(x, packed, num_actions):
    """Pure-JAX reference matching the kernel's folded bf16/f32 math exactly."""
    bf = lambda a: a.astype(jnp.bfloat16)
    h1 = jnp.dot(bf(x), packed["w1"], preferred_element_type=jnp.float32) + packed["b1"]
    h1 = jnp.maximum(h1, 0.0)
    h2 = jnp.dot(bf(h1), packed["w2"], preferred_element_type=jnp.float32) + packed["b2"]
    h2 = jnp.maximum(h2, 0.0)
    out = jnp.dot(bf(h2), packed["wh"], preferred_element_type=jnp.float32) + packed["bh"]
    a = num_actions
    return out[:, :a], jnp.exp(out[:, a:2 * a]), out[:, 2 * a:2 * a + 1]


def reference_forward_f32(x, p, num_actions):
    """Pure-f32 reference matching the original PyTorch module math."""
    h1 = jnp.maximum(x @ p["w1"] + p["b1"], 0.0)
    h2 = jnp.maximum(h1 @ p["w2"] + p["b2"], 0.0)
    enc = h2 @ p["w3"] + p["b3"]
    pol = enc @ p["wp"] + p["bp"]
    val = enc @ p["wv"] + p["bv"]
    return pol[:, :num_actions], jnp.exp(pol[:, num_actions:]), val


if __name__ == "__main__":
    # BipedalWalker-v3: obs_features=24, num_actions=4; small rollout batch.
    OBS_FEATURES = 24
    NUM_ACTIONS = 4
    BATCH = 8

    key = jax.random.PRNGKey(0)
    k_x, k_p = jax.random.split(key)

    x = jax.random.normal(k_x, (BATCH, OBS_FEATURES), jnp.float32)
    params = init_params(k_p, OBS_FEATURES, NUM_ACTIONS)
    packed = pack_params(params, OBS_FEATURES, NUM_ACTIONS)

    mean, std, value = bipedal_walker_ppo_forward(x, packed, NUM_ACTIONS)
    jax.block_until_ready((mean, std, value))

    assert mean.shape == (BATCH, NUM_ACTIONS)
    assert std.shape == (BATCH, NUM_ACTIONS)
    assert value.shape == (BATCH, 1)

    # (1) strict check against a reference that uses the same folded bf16 math
    p_mean, p_std, p_value = reference_forward_packed(x, packed, NUM_ACTIONS)
    assert jnp.allclose(mean, p_mean, atol=2e-2, rtol=2e-2)
    assert jnp.allclose(std, p_std, atol=2e-2, rtol=2e-2)
    assert jnp.allclose(value, p_value, atol=2e-2, rtol=2e-2)

    # (2) check against the unfolded pure-f32 PyTorch-equivalent math
    f_mean, f_std, f_value = reference_forward_f32(x, params, NUM_ACTIONS)
    assert jnp.allclose(mean, f_mean, atol=5e-2, rtol=5e-2)
    assert jnp.allclose(std, f_std, atol=5e-2, rtol=5e-2)
    assert jnp.allclose(value, f_value, atol=5e-2, rtol=5e-2)

    print("KERNEL_OK")
</pallas_src>

<mosaic_0001>
module attributes {stable_mosaic.version = 11 : i64} {
  func.func @_ppo_kernel(%arg0: i32, %arg1: memref<8x24xf32, #tpu.memory_space<vmem>>, %arg2: memref<24x256xbf16, #tpu.memory_space<vmem>>, %arg3: memref<1x256xf32, #tpu.memory_space<vmem>>, %arg4: memref<256x512xbf16, #tpu.memory_space<vmem>>, %arg5: memref<1x512xf32, #tpu.memory_space<vmem>>, %arg6: memref<512x128xbf16, #tpu.memory_space<vmem>>, %arg7: memref<1x128xf32, #tpu.memory_space<vmem>>, %arg8: memref<8x128xf32, #tpu.memory_space<vmem>>) attributes {dimension_semantics = [#tpu.dimension_semantics<parallel>], iteration_bounds = array<i64: 1>, scalar_prefetch = 0 : i64, scratch_operands = 0 : i64, tpu.core_type = #tpu.core_type<tc>, window_params = [{transform_indices = @transform_0, window_bounds = array<i64: 8, 24>}, {pipeline_mode = #tpu.pipeline_mode<synchronous>, transform_indices = @transform_1, window_bounds = array<i64: 24, 256>}, {pipeline_mode = #tpu.pipeline_mode<synchronous>, transform_indices = @transform_2, window_bounds = array<i64: 1, 256>}, {pipeline_mode = #tpu.pipeline_mode<synchronous>, transform_indices = @transform_3, window_bounds = array<i64: 256, 512>}, {pipeline_mode = #tpu.pipeline_mode<synchronous>, transform_indices = @transform_4, window_bounds = array<i64: 1, 512>}, {pipeline_mode = #tpu.pipeline_mode<synchronous>, transform_indices = @transform_5, window_bounds = array<i64: 512, 128>}, {pipeline_mode = #tpu.pipeline_mode<synchronous>, transform_indices = @transform_6, window_bounds = array<i64: 1, 128>}, {transform_indices = @transform_7, window_bounds = array<i64: 8, 128>}]} {
    %c0 = arith.constant 0 : index
    %c0_0 = arith.constant 0 : index
    %0 = vector.load %arg1[%c0, %c0_0] : memref<8x24xf32, #tpu.memory_space<vmem>>, vector<8x24xf32>
    %1 = arith.truncf %0 : vector<8x24xf32> to vector<8x24xbf16>
    %c0_1 = arith.constant 0 : index
    %c0_2 = arith.constant 0 : index
    %2 = vector.load %arg2[%c0_1, %c0_2] : memref<24x256xbf16, #tpu.memory_space<vmem>>, vector<24x256xbf16>
    %cst = arith.constant dense<0.000000e+00> : vector<8x256xf32>
    %3 = tpu.matmul %1, %2, %cst {dimension_numbers = #tpu.dot_dimension_numbers<[1], [0], [0], [1], [0, 0, 1, 1], [], []>} : vector<8x24xbf16>, vector<24x256xbf16>, vector<8x256xf32> -> vector<8x256xf32>
    %c0_3 = arith.constant 0 : index
    %c0_4 = arith.constant 0 : index
    %4 = vector.load %arg3[%c0_3, %c0_4] : memref<1x256xf32, #tpu.memory_space<vmem>>, vector<1x256xf32>
    %5 = vector.broadcast %4 : vector<1x256xf32> to vector<8x256xf32>
    %6 = arith.addf %3, %5 : vector<8x256xf32>
    %cst_5 = arith.constant 0.000000e+00 : f32
    %7 = vector.broadcast %cst_5 : f32 to vector<8x256xf32>
    %8 = arith.maximumf %6, %7 : vector<8x256xf32>
    %9 = arith.truncf %8 : vector<8x256xf32> to vector<8x256xbf16>
    %c0_6 = arith.constant 0 : index
    %c0_7 = arith.constant 0 : index
    %10 = vector.load %arg4[%c0_6, %c0_7] : memref<256x512xbf16, #tpu.memory_space<vmem>>, vector<256x512xbf16>
    %cst_8 = arith.constant dense<0.000000e+00> : vector<8x512xf32>
    %11 = tpu.matmul %9, %10, %cst_8 {dimension_numbers = #tpu.dot_dimension_numbers<[1], [0], [0], [1], [0, 0, 1, 1], [], []>} : vector<8x256xbf16>, vector<256x512xbf16>, vector<8x512xf32> -> vector<8x512xf32>
    %c0_9 = arith.constant 0 : index
    %c0_10 = arith.constant 0 : index
    %12 = vector.load %arg5[%c0_9, %c0_10] : memref<1x512xf32, #tpu.memory_space<vmem>>, vector<1x512xf32>
    %13 = vector.broadcast %12 : vector<1x512xf32> to vector<8x512xf32>
    %14 = arith.addf %11, %13 : vector<8x512xf32>
    %cst_11 = arith.constant 0.000000e+00 : f32
    %15 = vector.broadcast %cst_11 : f32 to vector<8x512xf32>
    %16 = arith.maximumf %14, %15 : vector<8x512xf32>
    %17 = arith.truncf %16 : vector<8x512xf32> to vector<8x512xbf16>
    %c0_12 = arith.constant 0 : index
    %c0_13 = arith.constant 0 : index
    %18 = vector.load %arg6[%c0_12, %c0_13] : memref<512x128xbf16, #tpu.memory_space<vmem>>, vector<512x128xbf16>
    %cst_14 = arith.constant dense<0.000000e+00> : vector<8x128xf32>
    %19 = tpu.matmul %17, %18, %cst_14 {dimension_numbers = #tpu.dot_dimension_numbers<[1], [0], [0], [1], [0, 0, 1, 1], [], []>} : vector<8x512xbf16>, vector<512x128xbf16>, vector<8x128xf32> -> vector<8x128xf32>
    %c0_15 = arith.constant 0 : index
    %c0_16 = arith.constant 0 : index
    %20 = vector.load %arg7[%c0_15, %c0_16] : memref<1x128xf32, #tpu.memory_space<vmem>>, vector<1x128xf32>
    %21 = vector.broadcast %20 : vector<1x128xf32> to vector<8x128xf32>
    %22 = arith.addf %19, %21 : vector<8x128xf32>
    %c0_17 = arith.constant 0 : index
    %c0_18 = arith.constant 0 : index
    %23 = vector.load %arg8[%c0_17, %c0_18] : memref<8x128xf32, #tpu.memory_space<vmem>>, vector<8x128xf32>
    tpu.vector_store %arg8[%c0_17, %c0_18], %22 {strides = array<i32>} : memref<8x128xf32, #tpu.memory_space<vmem>>, vector<8x128xf32>,
    return
  }
  func.func @transform_0(%arg0: i32) -> (i32, i32) {
    %c0_i32 = arith.constant 0 : i32
    %c0_i32_0 = arith.constant 0 : i32
    return %arg0, %c0_i32 : i32, i32
  }
  func.func @transform_1(%arg0: i32) -> (i32, i32) {
    %c0_i32 = arith.constant 0 : i32
    %c0_i32_0 = arith.constant 0 : i32
    %c0_i32_1 = arith.constant 0 : i32
    return %c0_i32, %c0_i32_0 : i32, i32
  }
  func.func @transform_2(%arg0: i32) -> (i32, i32) {
    %c0_i32 = arith.constant 0 : i32
    %c0_i32_0 = arith.constant 0 : i32
    %c0_i32_1 = arith.constant 0 : i32
    return %c0_i32, %c0_i32_0 : i32, i32
  }
  func.func @transform_3(%arg0: i32) -> (i32, i32) {
    %c0_i32 = arith.constant 0 : i32
    %c0_i32_0 = arith.constant 0 : i32
    %c0_i32_1 = arith.constant 0 : i32
    return %c0_i32, %c0_i32_0 : i32, i32
  }
  func.func @transform_4(%arg0: i32) -> (i32, i32) {
    %c0_i32 = arith.constant 0 : i32
    %c0_i32_0 = arith.constant 0 : i32
    %c0_i32_1 = arith.constant 0 : i32
    return %c0_i32, %c0_i32_0 : i32, i32
  }
  func.func @transform_5(%arg0: i32) -> (i32, i32) {
    %c0_i32 = arith.constant 0 : i32
    %c0_i32_0 = arith.constant 0 : i32
    %c0_i32_1 = arith.constant 0 : i32
    return %c0_i32, %c0_i32_0 : i32, i32
  }
  func.func @transform_6(%arg0: i32) -> (i32, i32) {
    %c0_i32 = arith.constant 0 : i32
    %c0_i32_0 = arith.constant 0 : i32
    %c0_i32_1 = arith.constant 0 : i32
    return %c0_i32, %c0_i32_0 : i32, i32
  }
  func.func @transform_7(%arg0: i32) -> (i32, i32) {
    %c0_i32 = arith.constant 0 : i32
    %c0_i32_0 = arith.constant 0 : i32
    return %arg0, %c0_i32 : i32, i32
  }
}

</mosaic_0001>

<bundles_post_ra>
// kernel: tpu_custom_call.1
= control target key start
LH: loop header
LB: loop body
LE: loop exit
PB: predicated region body
PF: predicated region fallthrough
CT: control target
= control target key end

     0   :  { %12 = vsyncpa [#allocation3], 0  ;;  %s1571_s0 = inlined_call_operand.hbm [shape: f32[8,24], index: 0, kind: input, shape index: {}]   ;;  %s1572_s1 = inlined_call_operand.hbm [shape: bf16[24,256], index: 1, kind: input, shape index: {}]   ;;  %s1573_s2 = inlined_call_operand.vmem [shape: f32[1,256], index: 2, kind: input, shape index: {}]   ;;  %s1574_s3 = inlined_call_operand.hbm [shape: bf16[256,512], index: 3, kind: input, shape index: {}]   ;;  %s1575_s4 = inlined_call_operand.vmem [shape: f32[1,512], index: 4, kind: input, shape index: {}]   ;;  %s1576_s5 = inlined_call_operand.hbm [shape: bf16[512,128], index: 5, kind: input, shape index: {}]   ;;  %s1577_s6 = inlined_call_operand.vmem [shape: f32[1,128], index: 6, kind: input, shape index: {}]   ;;  %s1578_s7 = inlined_call_operand.hbm [shape: f32[8,128], index: 7, kind: output, shape index: {}]  }
   0x1   :  { %13 = vsyncpa [#allocation6], 0 }
   0x2   :  { %14 = vsyncpa [#allocation9], 0 }
   0x3   :  { %15 = vsyncpa [#allocation4], 0  ;;  %s1436_s24 = smov [#allocation5]   ;;  %s1318_s28 = scalar_lea.hbm %s1572_s1, 384 }
   0x4   :  { %s31_s25 = sshll.u32 %s1436_s24, 4  ;;  %p1319_p0 = scmp.ne.s32.totalorder %s1572_s1, %s1318_s28  ;;  %s32_s25 = int_to_ptr.vmem [resolvable:$true] %s31_s25 }
   0x5   :  { %p1322_p1 = scmp.lt.u32.totalorder %s1318_s28, %s1572_s1 }
   0x7   :  { %p1324_p2 = pnand %p1322_p1, %p1319_p0 }
   0x9   :  { %1327 = shalt.err (!%p1324_p2)
}
   0xa   :  { %s1328_s10 = scalar_lea.vmem %s32_s25, 384  ;;  %p1333_p4 = scmp.lt.s32.totalorder %s32_s25, %s32_s25 }
   0xb   :  { %p1329_p3 = scmp.ne.s32.totalorder %s32_s25, %s1328_s10  ;;  %p1334_p5 = scmp.lt.s32.totalorder %s1328_s10, %s1328_s10 }
   0xd   :  { %p1335_p6 = por %p1334_p5, %p1333_p4 }
   0xf   :  { %p1336_p7 = pnand %p1335_p6, %p1329_p3 }
  0x11   :  { %1339 = shalt.err (!%p1336_p7)
}
  0x12   :  { %s1437_s11 = smov 128   ;;  %s1438_s12 = smov 8  }
  0x13   :  { %37 = dma.hbm_to_vmem [thread:$0]  %s1572_s1, 384, %s32_s25, [#allocation6], %s1437_s11, %s1437_s11, %s1438_s12  }
  0x14   :  { %s1439_s15 = smov [#allocation2]   ;;  %s1440_s17 = smov [#allocation7]  }
  0x15   :  { %s22_s16 = sshll.u32 %s1439_s15, 4  ;;  %s45_s18 = sshll.u32 %s1440_s17, 4  ;;  %s23_s16 = int_to_ptr.vmem [resolvable:$true] %s22_s16  ;;  %s46_s18 = int_to_ptr.vmem [resolvable:$true] %s45_s18 }
  0x16   :  { %s1340_s21 = scalar_lea.hbm %s1571_s0, 128 }
  0x17   :  { %p1341_p8 = scmp.ne.s32.totalorder %s1571_s0, %s1340_s21  ;;  %p1344_p9 = scmp.lt.u32.totalorder %s1340_s21, %s1571_s0 }
  0x19   :  { %p1346_p10 = pnand %p1344_p9, %p1341_p8 }
  0x1b   :  { %1349 = shalt.err (!%p1346_p10)
}
  0x1c   :  { %s1350_s1 = scalar_lea.vmem %s23_s16, 128  ;;  %p1355_p12 = scmp.lt.s32.totalorder %s23_s16, %s23_s16 }
  0x1d   :  { %p1351_p11 = scmp.ne.s32.totalorder %s23_s16, %s1350_s1  ;;  %p1356_p13 = scmp.lt.s32.totalorder %s1350_s1, %s1350_s1 }
  0x1f   :  { %p1357_p0 = por %p1356_p13, %p1355_p12 }
  0x21   :  { %p1358_p1 = pnand %p1357_p0, %p1351_p11 }
  0x23   :  { %1361 = shalt.err (!%p1358_p1)
}
  0x24   :  { %25 = dma.hbm_to_vmem [thread:$0]  %s1571_s0, 128, %s23_s16, [#allocation3]  }
  0x25   :  { %s1362_s30 = scalar_lea.hbm %s1574_s3, 8192 }
  0x26   :  { %p1363_p2 = scmp.ne.s32.totalorder %s1574_s3, %s1362_s30  ;;  %p1366_p3 = scmp.lt.u32.totalorder %s1362_s30, %s1574_s3 }
  0x28   :  { %p1368_p4 = pnand %p1366_p3, %p1363_p2 }
  0x2a   :  { %1371 = shalt.err (!%p1368_p4)
}
  0x2b   :  { %s1372_s12 = scalar_lea.vmem %s46_s18, 8192  ;;  %p1377_p6 = scmp.lt.s32.totalorder %s46_s18, %s46_s18 }
  0x2c   :  { %p1373_p5 = scmp.ne.s32.totalorder %s46_s18, %s1372_s12  ;;  %p1378_p7 = scmp.lt.s32.totalorder %s1372_s12, %s1372_s12 }
  0x2e   :  { %p1379_p8 = por %p1378_p7, %p1377_p6 }
  0x30   :  { %p1380_p9 = pnand %p1379_p8, %p1373_p5 }
  0x32   :  { %1383 = shalt.err (!%p1380_p9)
}
  0x33   :  { %s1441_s0 = smov 256   ;;  %s1442_s13 = smov 16  }
  0x34   :  { %51 = dma.hbm_to_vmem [thread:$0]  %s1574_s3, 8192, %s46_s18, [#allocation6], %s1441_s0, %s1441_s0, %s1442_s13  }
  0x35   :  { %s1443_s16 = smov [#allocation8]   ;;  %s1384_s21 = scalar_lea.hbm %s1576_s5, 4096 }
  0x36   :  { %s59_s17 = sshll.u32 %s1443_s16, 4  ;;  %p1385_p10 = scmp.ne.s32.totalorder %s1576_s5, %s1384_s21  ;;  %s60_s17 = int_to_ptr.vmem [resolvable:$true] %s59_s17 }
  0x37   :  { %p1388_p11 = scmp.lt.u32.totalorder %s1384_s21, %s1576_s5 }
  0x39   :  { %p1390_p12 = pnand %p1388_p11, %p1385_p10 }
  0x3b   :  { %1393 = shalt.err (!%p1390_p12)
}
  0x3c   :  { %s1394_s1 = scalar_lea.vmem %s60_s17, 4096  ;;  %p1399_p0 = scmp.lt.s32.totalorder %s60_s17, %s60_s17 }
  0x3d   :  { %p1395_p13 = scmp.ne.s32.totalorder %s60_s17, %s1394_s1  ;;  %p1400_p1 = scmp.lt.s32.totalorder %s1394_s1, %s1394_s1 }
  0x3f   :  { %p1401_p2 = por %p1400_p1, %p1399_p0 }
  0x41   :  { %p1402_p3 = pnand %p1401_p2, %p1395_p13 }
  0x43   :  { %1405 = shalt.err (!%p1402_p3)
}
  0x44   :  { %s1444_s3 = smov 64   ;;  %s1445_s18 = smov 4  }
  0x45   :  { %65 = dma.hbm_to_vmem [thread:$0]  %s1576_s5, 4096, %s60_s17, [#allocation9], %s1444_s3, %s1444_s3, %s1445_s18  }
  0x46   :  { %1428 = dma.done.wait [#allocation3], 128  }
  0x47   :  { %1429 = vsyncadd [#allocation3], 4294967168 }
  0x48   :  { %1430 = dma.done.wait [#allocation6], 8576  }
  0x49   :  { %1431 = vsyncadd [#allocation6], 4294958720 }
  0x4a   :  { %1432 = dma.done.wait [#allocation9], 4096  }
  0x4b   :  { %1433 = vsyncadd [#allocation9], 4294963200  ;;  %v1446_v0 = vmov 0   ;;  %v1185_v1 = vld [vmem:[#allocation5 + $0x4] ss:$8 sps:$4 sm:$0xff]   ;;  %v85_v3 = vld [vmem:[#allocation5 + $0x10] sm:$0xff] }
  0x4c   :  { %156 = vmatprep.mubr.bf16.mxu0 %v1446_v0  ;;  %v1187_v2 = vld [vmem:[#allocation5] ss:$8 sps:$4 sm:$0xff]   ;;  %vm117_vm0 = vcmask 1043456   ;;  %124 = vmatprep.subr.bf16.mxu0 %v1185_v1  ;;  %v1029_v4 = vcombine.high %v85_v3, %v85_v3  ;;  %v1028_v5 = vcombine.low %v85_v3, %v85_v3  ;;  %v1190_v6 = vld [vmem:[#allocation7 + $0x4] ss:$16 sps:$4 sm:$0xff]   ;;  %vm113_vm1 = vcmask 195584  }
  0x4d   :  { %125 = vmatpush1.bf16.msra.mxu0 %v1187_v2  ;;  %v81_v7 = vld [vmem:[#allocation2] sm:$0xff]  ;;  %575 = vmatprep.subr.bf16.mxu1 %v1190_v6  ;;  %v1194_v9 = vld [vmem:[#allocation7 + $0xc] ss:$16 sps:$4 sm:$0xff]   ;;  %v1192_v13 = vld [vmem:[#allocation7 + $0x8] ss:$16 sps:$4 sm:$0xff]   ;;  %s1447_s8 = smov [#allocation10]  }
  0x4e   :  { %1030 = vmatprep.subr.msk.bf16.mxu0 %vm117_vm0, %v1029_v4  ;;  %v119_v8 = vsel %vm117_vm0, %v1028_v5, 0  ;;  %v1195_v10 = vld [vmem:[#allocation7] ss:$16 sps:$4 sm:$0xff]   ;;  %v1196_v11 = vld [vmem:[#allocation7 + $0x24] ss:$16 sps:$4 sm:$0xff]   ;;  %v82_v12 = vpack.c.bf16 %v81_v7, %v81_v7  ;;  %s1015_s9 = sshll.u32 %s1447_s8, 4  ;;  %s1016_s9 = int_to_ptr.vmem [resolvable:$true] %s1015_s9 }
  0x4f   :  { %576 = vmatpush1.bf16.msra.mxu1 %v1195_v10  ;;  %v1200_v14 = vld [vmem:[#allocation7 + $0x2c] ss:$16 sps:$4 sm:$0xff]   ;;  %v1201_v15 = vld [vmem:[#allocation7 + $0x20] ss:$16 sps:$4 sm:$0xff]   ;;  %v1202_v16 = vld [vmem:[#allocation7 + $0x44] ss:$16 sps:$4 sm:$0xff]   ;;  %p1411_p5 = scmp.lt.s32.totalorder %s1016_s9, %s1016_s9 }
  0x50   :  { %577 = vmatprep.subr.bf16.mxu1 %v1196_v11  ;;  %v1198_v17 = vld [vmem:[#allocation7 + $0x28] ss:$16 sps:$4 sm:$0xff]   ;;  %v1207_v18 = vld [vmem:[#allocation7 + $0x40] ss:$16 sps:$4 sm:$0xff]   ;;  %v1208_v19 = vld [vmem:[#allocation7 + $0x64] ss:$16 sps:$4 sm:$0xff]   ;;  %v88_v11 = vlaneseq }
  0x51   :  { %127 = vmatpush1.bf16.msra.mxu0 %v119_v8  ;;  %v1206_v20 = vld [vmem:[#allocation7 + $0x4c] ss:$16 sps:$4 sm:$0xff]   ;;  %v1204_v21 = vld [vmem:[#allocation7 + $0x48] ss:$16 sps:$4 sm:$0xff]   ;;  %v1213_v22 = vld [vmem:[#allocation7 + $0x60] ss:$16 sps:$4 sm:$0xff]  }
  0x52   :  { %616 = vmatprep.subr.bf16.mxu0 %v1194_v9  ;;  %v1214_v23 = vld [vmem:[#allocation7 + $0x84] ss:$16 sps:$4 sm:$0xff]   ;;  %v1212_v24 = vld [vmem:[#allocation7 + $0x6c] ss:$16 sps:$4 sm:$0xff]   ;;  %v1210_v25 = vld [vmem:[#allocation7 + $0x68] ss:$16 sps:$4 sm:$0xff]  }
  0x53   :  { %578 = vmatpush1.bf16.msra.mxu1 %v1201_v15  ;;  %v1219_v26 = vld [vmem:[#allocation7 + $0x80] ss:$16 sps:$4 sm:$0xff]   ;;  %v1220_v27 = vld [vmem:[#allocation7 + $0xa4] ss:$16 sps:$4 sm:$0xff]   ;;  %v1218_v28 = vld [vmem:[#allocation7 + $0x8c] ss:$16 sps:$4 sm:$0xff]  }
  0x54   :  { %1031 = vmatmul.mubr.msk.bf16.vlgmr.msra.gmra.mrb[0].mxu0 %vm113_vm1, %v82_v12  ;;  %579 = vmatprep.subr.bf16.mxu1 %v1202_v16  ;;  %v1216_v29 = vld [vmem:[#allocation7 + $0x88] ss:$16 sps:$4 sm:$0xff]   ;;  %v1225_v30 = vld [vmem:[#allocation7 + $0xa0] ss:$16 sps:$4 sm:$0xff]   ;;  %v1226_v31 = vld [vmem:[#allocation7 + $0xc4] ss:$16 sps:$4 sm:$0xff]  }
  0x55   :  { %617 = vmatpush1.bf16.msra.mxu0 %v1192_v13  ;;  %v1224_v32 = vld [vmem:[#allocation7 + $0xac] ss:$16 sps:$4 sm:$0xff]   ;;  %v1222_v33 = vld [vmem:[#allocation7 + $0xa8] ss:$16 sps:$4 sm:$0xff]   ;;  %v1231_v34 = vld [vmem:[#allocation7 + $0xc0] ss:$16 sps:$4 sm:$0xff]  }
  0x56   :  { %618 = vmatprep.subr.bf16.mxu0 %v1200_v14  ;;  %v1232_v35 = vld [vmem:[#allocation7 + $0xe4] ss:$16 sps:$4 sm:$0xff]   ;;  %v1230_v36 = vld [vmem:[#allocation7 + $0xcc] ss:$16 sps:$4 sm:$0xff]   ;;  %v1228_v37 = vld [vmem:[#allocation7 + $0xc8] ss:$16 sps:$4 sm:$0xff]  }
  0x57   :  { %580 = vmatpush1.bf16.msra.mxu1 %v1207_v18  ;;  %v1237_v38 = vld [vmem:[#allocation7 + $0xe0] ss:$16 sps:$4 sm:$0xff]   ;;  %v1238_v39 = vld [vmem:[#allocation7 + $0x104] ss:$16 sps:$4 sm:$0xff]   ;;  %v1236_v40 = vld [vmem:[#allocation7 + $0xec] ss:$16 sps:$4 sm:$0xff]  }
  0x58   :  { %581 = vmatprep.subr.bf16.mxu1 %v1208_v19  ;;  %v1234_v41 = vld [vmem:[#allocation7 + $0xe8] ss:$16 sps:$4 sm:$0xff]   ;;  %v1243_v42 = vld [vmem:[#allocation7 + $0x100] ss:$16 sps:$4 sm:$0xff]   ;;  %v1244_v43 = vld [vmem:[#allocation7 + $0x124] ss:$16 sps:$4 sm:$0xff]  }
  0x59   :  { %619 = vmatpush1.bf16.msra.mxu0 %v1198_v17  ;;  %v1242_v44 = vld [vmem:[#allocation7 + $0x10c] ss:$16 sps:$4 sm:$0xff]   ;;  %v1240_v45 = vld [vmem:[#allocation7 + $0x108] ss:$16 sps:$4 sm:$0xff]   ;;  %v1249_v46 = vld [vmem:[#allocation7 + $0x120] ss:$16 sps:$4 sm:$0xff]  }
  0x5a   :  { %620 = vmatprep.subr.bf16.mxu0 %v1206_v20  ;;  %v1248_v47 = vld [vmem:[#allocation7 + $0x12c] ss:$16 sps:$4 sm:$0xff]   ;;  %v1250_v48 = vld [vmem:[#allocation7 + $0x144] ss:$16 sps:$4 sm:$0xff]   ;;  %v1255_v49 = vld [vmem:[#allocation7 + $0x140] ss:$16 sps:$4 sm:$0xff]  }
  0x5b   :  { %582 = vmatpush1.bf16.msra.mxu1 %v1213_v22  ;;  %v1246_v50 = vld [vmem:[#allocation7 + $0x128] ss:$16 sps:$4 sm:$0xff]   ;;  %v1256_v51 = vld [vmem:[#allocation7 + $0x164] ss:$16 sps:$4 sm:$0xff]   ;;  %v1254_v52 = vld [vmem:[#allocation7 + $0x14c] ss:$16 sps:$4 sm:$0xff]  }
  0x5c   :  { %583 = vmatprep.subr.bf16.mxu1 %v1214_v23  ;;  %v1261_v53 = vld [vmem:[#allocation7 + $0x160] ss:$16 sps:$4 sm:$0xff]   ;;  %v1252_v54 = vld [vmem:[#allocation7 + $0x148] ss:$16 sps:$4 sm:$0xff]   ;;  %v1262_v55 = vld [vmem:[#allocation7 + $0x184] ss:$16 sps:$4 sm:$0xff]  }
  0x5d   :  { %621 = vmatpush1.bf16.msra.mxu0 %v1204_v21  ;;  %v1260_v56 = vld [vmem:[#allocation7 + $0x16c] ss:$16 sps:$4 sm:$0xff]   ;;  %v1267_v57 = vld [vmem:[#allocation7 + $0x180] ss:$16 sps:$4 sm:$0xff]   ;;  %v1258_v58 = vld [vmem:[#allocation7 + $0x168] ss:$16 sps:$4 sm:$0xff]  }
  0x5e   :  { %622 = vmatprep.subr.bf16.mxu0 %v1212_v24  ;;  %v1268_v59 = vld [vmem:[#allocation7 + $0x1a4] ss:$16 sps:$4 sm:$0xff]   ;;  %v1266_v60 = vld [vmem:[#allocation7 + $0x18c] ss:$16 sps:$4 sm:$0xff]   ;;  %v1273_v61 = vld [vmem:[#allocation7 + $0x1a0] ss:$16 sps:$4 sm:$0xff]  }
  0x5f   :  { %584 = vmatpush1.bf16.msra.mxu1 %v1219_v26  ;;  %v1264_v62 = vld [vmem:[#allocation7 + $0x188] ss:$16 sps:$4 sm:$0xff]   ;;  %v1272_v63 = vld [vmem:[#allocation7 + $0x1ac] ss:$16 sps:$4 sm:$0xff]   ;;  %v1274_v1 = vld [vmem:[#allocation7 + $0x1c4] ss:$16 sps:$4 sm:$0xff]  }
  0x60   :  { %585 = vmatprep.subr.bf16.mxu1 %v1220_v27  ;;  %v1270_v0 = vld [vmem:[#allocation7 + $0x1a8] ss:$16 sps:$4 sm:$0xff]   ;;  %v1278_v2 = vld [vmem:[#allocation7 + $0x1cc] ss:$16 sps:$4 sm:$0xff]   ;;  %v1279_v4 = vld [vmem:[#allocation7 + $0x1c0] ss:$16 sps:$4 sm:$0xff]  }
  0x61   :  { %623 = vmatpush1.bf16.msra.mxu0 %v1210_v25  ;;  %v1276_v3 = vld [vmem:[#allocation7 + $0x1c8] ss:$16 sps:$4 sm:$0xff]   ;;  %v1280_v5 = vld [vmem:[#allocation7 + $0x1e4] ss:$16 sps:$4 sm:$0xff]   ;;  %v1284_v6 = vld [vmem:[#allocation7 + $0x1ec] ss:$16 sps:$4 sm:$0xff]  }
  0x62   :  { %624 = vmatprep.subr.bf16.mxu0 %v1218_v28  ;;  %v1282_v7 = vld [vmem:[#allocation7 + $0x1e8] ss:$16 sps:$4 sm:$0xff]   ;;  %v1285_v8 = vld [vmem:[#allocation7 + $0x1e0] ss:$16 sps:$4 sm:$0xff]   ;;  %v1536_v12 = vshrl.u32 %v88_v11, 7  ;;  %s1406_s10 = scalar_lea.vmem %s1016_s9, 128 }
  0x63   :  { %586 = vmatpush1.bf16.msra.mxu1 %v1225_v30  ;;  %v1286_v9 = vld [vmem:[#allocation8 + $0x40] sm:$0xff]   ;;  %v1290_v30 = vld [vmem:[#allocation8 + $0x48] sm:$0xff]   ;;  %p1407_p4 = scmp.ne.s32.totalorder %s1016_s9, %s1406_s10  ;;  %p1412_p6 = scmp.lt.s32.totalorder %s1406_s10, %s1406_s10 }
  0x64   :  { %587 = vmatprep.subr.bf16.mxu1 %v1226_v31  ;;  %v1287_v10 = vld [vmem:[#allocation8 + $0xc0] sm:$0xff]   ;;  %v90_v13 = vsub.s32 0, %v1536_v12  ;;  %v94_v15 = vsub.s32 1, %v1536_v12  ;;  %v1291_v31 = vld [vmem:[#allocation8 + $0xc8] sm:$0xff]  }
  0x65   :  { %625 = vmatpush1.bf16.msra.mxu0 %v1216_v29  ;;  %v86_v14 = vld [vmem:[%s1573_s2] sm:$0x3]  ;;  %p1413_p7 = por %p1412_p6, %p1411_p5 }
  0x66   :  { %626 = vmatprep.subr.bf16.mxu0 %v1224_v32  ;;  %v91_v16 = vrot.slane %v86_v14, %v90_v13  ;;  %v95_v17 = vrot.slane %v86_v14, %v94_v15  ;;  %v1288_v27 = vld [vmem:[#allocation8] sm:$0xff]   ;;  %v1292_v32 = vld [vmem:[#allocation8 + $0x8] sm:$0xff]  }
  0x67   :  { %588 = vmatpush1.bf16.msra.mxu1 %v1231_v34  ;;  %v1289_v28 = vld [vmem:[#allocation8 + $0x80] sm:$0xff]   ;;  %v1294_v34 = vld [vmem:[#allocation8 + $0x50] sm:$0xff]   ;;  %p1414_p8 = pnand %p1413_p7, %p1407_p4 }
  0x68   :  { %589 = vmatprep.subr.bf16.mxu1 %v1232_v35  ;;  %v1295_v35 = vld [vmem:[#allocation8 + $0xd0] sm:$0xff]  }
  0x69   :  { %627 = vmatpush1.bf16.msra.mxu0 %v1222_v33  ;;  %v1293_v33 = vld [vmem:[#allocation8 + $0x88] sm:$0xff]  }
  0x6a   :  { %628 = vmatprep.subr.bf16.mxu0 %v1230_v36  ;;  %v1296_v36 = vld [vmem:[#allocation8 + $0x10] sm:$0xff]  }
  0x6b   :  { %590 = vmatpush1.bf16.msra.mxu1 %v1237_v38  ;;  %v1298_v38 = vld [vmem:[#allocation8 + $0x58] sm:$0xff]  }
  0x6c   :  { %591 = vmatprep.subr.bf16.mxu1 %v1238_v39  ;;  %v1299_v39 = vld [vmem:[#allocation8 + $0xd8] sm:$0xff]  }
  0x6d   :  { %629 = vmatpush1.bf16.msra.mxu0 %v1228_v37  ;;  %v1297_v37 = vld [vmem:[#allocation8 + $0x90] sm:$0xff]  }
  0x6e   :  { %630 = vmatprep.subr.bf16.mxu0 %v1236_v40  ;;  %v1300_v40 = vld [vmem:[#allocation8 + $0x18] sm:$0xff]  }
  0x6f   :  { %592 = vmatpush1.bf16.msra.mxu1 %v1243_v42  ;;  %v1302_v42 = vld [vmem:[#allocation8 + $0x60] sm:$0xff]  }
  0x70   :  { %593 = vmatprep.subr.bf16.mxu1 %v1244_v43  ;;  %v1303_v43 = vld [vmem:[#allocation8 + $0xe0] sm:$0xff]  }
  0x71   :  { %631 = vmatpush1.bf16.msra.mxu0 %v1234_v41  ;;  %v1301_v41 = vld [vmem:[#allocation8 + $0x98] sm:$0xff]  }
  0x72   :  { %632 = vmatprep.subr.bf16.mxu0 %v1242_v44  ;;  %v1304_v44 = vld [vmem:[#allocation8 + $0x20] sm:$0xff]  }
  0x73   :  { %594 = vmatpush1.bf16.msra.mxu1 %v1249_v46  ;;  %v1306_v46 = vld [vmem:[#allocation8 + $0x68] sm:$0xff]  }
  0x74   :  { %595 = vmatprep.subr.bf16.mxu1 %v1250_v48  ;;  %v1308_v48 = vld [vmem:[#allocation8 + $0x28] sm:$0xff]  }
  0x75   :  { %633 = vmatpush1.bf16.msra.mxu0 %v1240_v45  ;;  %v1305_v45 = vld [vmem:[#allocation8 + $0xa0] sm:$0xff]  }
  0x76   :  { %634 = vmatprep.subr.bf16.mxu0 %v1248_v47  ;;  %v1307_v47 = vld [vmem:[#allocation8 + $0xe8] sm:$0xff]  }
  0x77   :  { %596 = vmatpush1.bf16.msra.mxu1 %v1255_v49  ;;  %v1309_v49 = vld [vmem:[#allocation8 + $0xa8] sm:$0xff]  }
  0x78   :  { %597 = vmatprep.subr.bf16.mxu1 %v1256_v51  ;;  %v1311_v51 = vld [vmem:[#allocation8 + $0xf0] sm:$0xff]  }
  0x79   :  { %635 = vmatpush1.bf16.msra.mxu0 %v1246_v50  ;;  %v1310_v50 = vld [vmem:[#allocation8 + $0x70] sm:$0xff]  }
  0x7a   :  { %636 = vmatprep.subr.bf16.mxu0 %v1254_v52  ;;  %v1312_v52 = vld [vmem:[#allocation8 + $0x30] sm:$0xff]  }
  0x7b   :  { %598 = vmatpush1.bf16.msra.mxu1 %v1261_v53  ;;  %v1313_v53 = vld [vmem:[#allocation8 + $0xb0] sm:$0xff]  }
  0x7c   :  { %599 = vmatprep.subr.bf16.mxu1 %v1262_v55  ;;  %v1315_v55 = vld [vmem:[#allocation8 + $0xf8] sm:$0xff]  }
  0x7d   :  { %637 = vmatpush1.bf16.msra.mxu0 %v1252_v54  ;;  %v1314_v54 = vld [vmem:[#allocation8 + $0x78] sm:$0xff]  }
  0x7e   :  { %638 = vmatprep.subr.bf16.mxu0 %v1260_v56  ;;  %v1316_v56 = vld [vmem:[#allocation8 + $0x38] sm:$0xff]  }
  0x7f   :  { %600 = vmatpush1.bf16.msra.mxu1 %v1267_v57  ;;  %v1317_v57 = vld [vmem:[#allocation8 + $0xb8] sm:$0xff]  }
  0x80   :  { %601 = vmatprep.subr.bf16.mxu1 %v1268_v59  ;;  %v233_v59 = vld [vmem:[%s1575_s4] sm:$0xf] }
  0x81   :  { %639 = vmatpush1.bf16.msra.mxu0 %v1258_v58  ;;  %v245_v58 = vsub.s32 2, %v1536_v12 }
  0x82   :  { %640 = vmatprep.subr.bf16.mxu0 %v1266_v60  ;;  %v249_v60 = vsub.s32 3, %v1536_v12 }
  0x83   :  { %602 = vmatpush1.bf16.msra.mxu1 %v1273_v61  ;;  %v238_v61 = vrot.slane %v233_v59, %v90_v13 }
  0x84   :  { %603 = vmatprep.subr.bf16.mxu1 %v1274_v1 }
  0x85   :  { %641 = vmatpush1.bf16.msra.mxu0 %v1264_v62  ;;  %v246_v62 = vrot.slane %v233_v59, %v245_v58 }
  0x86   :  { %642 = vmatprep.subr.bf16.mxu0 %v1272_v63  ;;  %v242_v63 = vrot.slane %v233_v59, %v94_v15 }
  0x87   :  { %604 = vmatpush1.bf16.msra.mxu1 %v1279_v4 }
  0x88   :  { %605 = vmatprep.subr.bf16.mxu1 %v1280_v5 }
  0x89   :  { %643 = vmatpush1.bf16.msra.mxu0 %v1270_v0  ;;  %v250_v0 = vrot.slane %v233_v59, %v249_v60 }
  0x8a   :  { %644 = vmatprep.subr.bf16.mxu0 %v1278_v2 }
  0x8b   :  { %606 = vmatpush1.bf16.msra.mxu1 %v1285_v8 }
  0x8c   :  { %1129 = vmatprep.subr.bf16.mxu1 %v1286_v9 }
  0x8d   :  { %645 = vmatpush1.bf16.msra.mxu0 %v1276_v3 }
  0x8e   :  { %646 = vmatprep.subr.bf16.mxu0 %v1284_v6 }
  0x91   :  { %647 = vmatpush1.bf16.msra.mxu0 %v1282_v7 }
  0x92   :  { %1151 = vmatprep.subr.bf16.mxu0 %v1287_v10 }
 0x127   :  { %v158_v18 = vpop.f32.mrb[0].mxu0 }
 0x128   :  { %v159_v19 = vadd.f32 %v158_v18, %v91_v16  ;;  %v160_v20 = vpop.f32.mrb[1].mxu0 }
 0x129   :  { %v161_v21 = vadd.f32 %v160_v20, %v95_v17  ;;  %v162_v22 = vpop.f32.mrb[2].mxu0 }
 0x12a   :  { %v165_v23 = vmax.f32 %v159_v19, 0.0  ;;  %v163_v24 = vpop.f32.mrb[3].mxu0 }
 0x12b   :  { %v166_v25 = vmax.f32 %v161_v21, 0.0 }
 0x12c   :  { %v167_v29 = vpack.c.bf16 %v165_v23, %v165_v23  ;;  %v1096_v23 = vld [vmem:[%s1577_s6] ss:$0 sm:$0xff] }
 0x12d   :  { %v168_v26 = vpack.c.bf16 %v166_v25, %v166_v25 }
 0x12f   :  { %607 = vmatprep.mubr.bf16.mxu1 %v168_v26  ;;  %648 = vmatprep.mubr.bf16.mxu0 %v168_v26 }
 0x130   :  { %608 = vmatmul.mubr.bf16.vlgmr.msra.gmra.mrb[0].mxu1 %v167_v29  ;;  %649 = vmatmul.mubr.bf16.vlgmr.msra.gmra.mrb[4].mxu0 %v167_v29 }
 0x131   :  { %1130 = vmatpush3.bf16.msra.mxu1 %v1288_v27  ;;  %1152 = vmatpush3.bf16.msra.mxu0 %v1289_v28 }
 0x132   :  { %1131 = vmatprep.subr.bf16.mxu1 %v1290_v30  ;;  %1153 = vmatprep.subr.bf16.mxu0 %v1291_v31 }
 0x135   :  { %1132 = vmatpush3.bf16.msra.mxu1 %v1292_v32  ;;  %1154 = vmatpush3.bf16.msra.mxu0 %v1293_v33 }
 0x136   :  { %1133 = vmatprep.subr.bf16.mxu1 %v1294_v34  ;;  %1155 = vmatprep.subr.bf16.mxu0 %v1295_v35 }
 0x139   :  { %1134 = vmatpush3.bf16.msra.mxu1 %v1296_v36  ;;  %1156 = vmatpush3.bf16.msra.mxu0 %v1297_v37 }
 0x13a   :  { %1135 = vmatprep.subr.bf16.mxu1 %v1298_v38  ;;  %1157 = vmatprep.subr.bf16.mxu0 %v1299_v39 }
 0x13d   :  { %1136 = vmatpush3.bf16.msra.mxu1 %v1300_v40  ;;  %1158 = vmatpush3.bf16.msra.mxu0 %v1301_v41 }
 0x13e   :  { %1137 = vmatprep.subr.bf16.mxu1 %v1302_v42  ;;  %1159 = vmatprep.subr.bf16.mxu0 %v1303_v43 }
 0x141   :  { %1138 = vmatpush3.bf16.msra.mxu1 %v1304_v44  ;;  %1160 = vmatpush3.bf16.msra.mxu0 %v1305_v45 }
 0x142   :  { %1139 = vmatprep.subr.bf16.mxu1 %v1306_v46  ;;  %1161 = vmatprep.subr.bf16.mxu0 %v1307_v47 }
 0x145   :  { %1140 = vmatpush3.bf16.msra.mxu1 %v1308_v48  ;;  %1162 = vmatpush3.bf16.msra.mxu0 %v1309_v49 }
 0x146   :  { %1141 = vmatprep.subr.bf16.mxu1 %v1310_v50  ;;  %1163 = vmatprep.subr.bf16.mxu0 %v1311_v51 }
 0x149   :  { %1142 = vmatpush3.bf16.msra.mxu1 %v1312_v52  ;;  %1164 = vmatpush3.bf16.msra.mxu0 %v1313_v53 }
 0x14a   :  { %1143 = vmatprep.subr.bf16.mxu1 %v1314_v54  ;;  %1165 = vmatprep.subr.bf16.mxu0 %v1315_v55 }
 0x14d   :  { %1144 = vmatpush3.bf16.msra.mxu1 %v1316_v56  ;;  %1166 = vmatpush3.bf16.msra.mxu0 %v1317_v57 }
 0x203   :  { %v609_v1 = vpop.f32.mrb[0].mxu1  ;;  %v650_v2 = vpop.f32.mrb[4].mxu0 }
 0x204   :  { %v610_v3 = vadd.f32 %v609_v1, %v238_v61  ;;  %v651_v4 = vadd.f32 %v650_v2, %v246_v62  ;;  %v611_v5 = vpop.f32.mrb[1].mxu1  ;;  %v652_v6 = vpop.f32.mrb[5].mxu0 }
 0x205   :  { %v612_v7 = vadd.f32 %v611_v5, %v242_v63  ;;  %v653_v8 = vadd.f32 %v652_v6, %v250_v0  ;;  %v613_v9 = vpop.f32.mrb[2].mxu1  ;;  %v654_v10 = vpop.f32.mrb[6].mxu0 }
 0x206   :  { %v657_v11 = vmax.f32 %v610_v3, 0.0  ;;  %v659_v14 = vmax.f32 %v651_v4, 0.0  ;;  %v614_v16 = vpop.f32.mrb[3].mxu1  ;;  %v655_v17 = vpop.f32.mrb[7].mxu0 }
 0x207   :  { %v658_v13 = vmax.f32 %v612_v7, 0.0  ;;  %v660_v18 = vmax.f32 %v653_v8, 0.0 }
 0x208   :  { %v661_v15 = vpack.c.bf16 %v657_v11, %v657_v11  ;;  %v663_v20 = vpack.c.bf16 %v659_v14, %v659_v14 }
 0x209   :  { %v662_v19 = vpack.c.bf16 %v658_v13, %v658_v13  ;;  %v664_v12 = vpack.c.bf16 %v660_v18, %v660_v18 }
 0x20b   :  { %960 = vmatprep.mubr.bf16.mxu1 %v662_v19  ;;  %1000 = vmatprep.mubr.bf16.mxu0 %v664_v12 }
 0x20c   :  { %961 = vmatmul.mubr.bf16.vlgmr.msra.gmra.mrb[4].mxu1 %v661_v15  ;;  %1001 = vmatmul.mubr.bf16.vlgmr.msra.gmra.mrb[8].mxu0 %v663_v20 }
 0x2df   :  { %v1145_v21 = vpop.f32.mrb[4].mxu1  ;;  %v1167_v22 = vpop.f32.mrb[8].mxu0 }
 0x2e0   :  { %v1146_v24 = vpop.f32.mrb[5].mxu1  ;;  %v1168_v25 = vpop.f32.mrb[9].mxu0 }
 0x2e1   :  { %v1147_v26 = vadd.f32 %v1146_v24, %v1145_v21  ;;  %v1169_v27 = vadd.f32 %v1168_v25, %v1167_v22  ;;  %v1148_v28 = vpop.f32.mrb[6].mxu1  ;;  %v1170_v29 = vpop.f32.mrb[10].mxu0 }
 0x2e2   :  { %v1149_v30 = vpop.f32.mrb[7].mxu1  ;;  %v1171_v31 = vpop.f32.mrb[11].mxu0 }
 0x2e3   :  { %v963_v32 = vadd.f32 %v1147_v26, %v1096_v23 }
 0x2e5   :  { %v1003_v33 = vadd.f32 %v1169_v27, %v963_v32 }
 0x2e7   :  { %1008 = vst [vmem:[#allocation10] sm:$0xff] %v1003_v33 }
 0x2e8   :  { %1417 = shalt.err (!%p1414_p8)
}
 0x2e9   :  { %s1418_s12 = scalar_lea.hbm %s1578_s7, 128 }
 0x2ea   :  { %p1419_p9 = scmp.ne.s32.totalorder %s1578_s7, %s1418_s12  ;;  %p1422_p10 = scmp.lt.u32.totalorder %s1418_s12, %s1578_s7 }
 0x2ec   :  { %p1424_p11 = pnand %p1422_p10, %p1419_p9 }
 0x2ee   :  { %1427 = shalt.err (!%p1424_p11)
}
 0x2ef   :  { %1018 = dma.vmem_to_hbm [thread:$0]  %s1016_s9, 128, %s1578_s7, [#allocation4]  }
 0x2f0   :  { %1434 = dma.done.wait [#allocation4], 128  }
 0x2f1   :  { %1435 = vsyncadd [#allocation4], 4294967168 }
 0x2f2   :  { %1022 = vsyncpa [#allocation3], 1 }
 0x2f3   :  { %1023 = vsyncpa [#allocation6], 1 }
 0x2f4   :  { %1024 = vsyncpa [#allocation9], 1 }
 0x2f5   :  { %1025 = vsyncpa [#allocation4], 1 }

</bundles_post_ra>
